<compile_context>
chip_gen: v6e
topology: v6e:2x2x1
jax: 0.10.0
libtpu: 0.0.40
codegen_flags: <defaults>
</compile_context>

<pallas_src>
import math

import jax
import jax.numpy as jnp
from jax import lax
from jax.experimental import pallas as pl
from jax.experimental.pallas import tpu as pltpu

_GELU_C = math.sqrt(2.0 / math.pi)


def _round_up(a, b):
    return (a + b - 1) // b * b


def _linear_newgelu_kernel(x_ref, w_ref, b_ref, o_ref, acc_ref):
    # x_ref:   (tm, tk)  activation tile
    # w_ref:   (tn, tk)  weight tile, PyTorch (N, K) layout
    # b_ref:   (1,  tn)  bias tile
    # o_ref:   (tm, tn)  output tile
    # acc_ref: (tm, tn)  f32 accumulator (VMEM scratch, resident across K steps)
    k = pl.program_id(2)

    @pl.when(k == 0)
    def _():
        acc_ref[...] = jnp.zeros_like(acc_ref)

    # x @ W.T  -- contract the K (last) dim of both tiles directly on the MXU.
    acc_ref[...] += lax.dot_general(
        x_ref[...],
        w_ref[...],
        dimension_numbers=(((1,), (1,)), ((), ())),
        preferred_element_type=jnp.float32,
    )

    @pl.when(k == pl.num_programs(2) - 1)
    def _():
        y = acc_ref[...] + b_ref[...].astype(jnp.float32)
        # "new" GELU (tanh approximation), all in f32 before the final cast.
        inner = _GELU_C * (y + 0.044715 * (y * y * y))
        out = 0.5 * y * (1.0 + jnp.tanh(inner))
        o_ref[...] = out.astype(o_ref.dtype)


def linear_new_gelu(x, weight, bias=None, *, tm=128, tn=256, tk=512):
    """Fused Linear + NewGELU.

    x:      (..., K) activations
    weight: (N, K)   PyTorch nn.Linear layout (out_features, in_features)
    bias:   (N,) or None
    """
    *lead, K = x.shape
    N = weight.shape[0]
    M = 1
    for d in lead:
        M *= d

    if bias is None:
        bias = jnp.zeros((N,), dtype=x.dtype)

    # Minimum sublane granularity for the second-to-last dim of a tile.
    sub = 16 if x.dtype == jnp.bfloat16 else 8

    # Clamp tile sizes for small problems, then pad arrays up to tile multiples.
    tm = min(tm, _round_up(M, sub))
    tn = min(tn, _round_up(N, 128))
    tk = min(tk, _round_up(K, 128))
    Mp = _round_up(M, tm)
    Np = _round_up(N, tn)
    Kp = _round_up(K, tk)

    x2d = x.reshape(M, K)
    if (Mp, Kp) != (M, K):
        x2d = jnp.pad(x2d, ((0, Mp - M), (0, Kp - K)))
    w = weight
    if (Np, Kp) != (N, K):
        w = jnp.pad(w, ((0, Np - N), (0, Kp - K)))
    b = bias
    if Np != N:
        b = jnp.pad(b, (0, Np - N))
    b2d = b.reshape(1, Np)

    grid = (Mp // tm, Np // tn, Kp // tk)

    itemsize = jnp.dtype(x.dtype).itemsize
    cost = pl.CostEstimate(
        flops=2 * Mp * Np * Kp,
        transcendentals=Mp * Np,  # one tanh per output element
        bytes_accessed=(Mp * Kp + Np * Kp + Np) * itemsize + Mp * Np * itemsize,
    )

    out = pl.pallas_call(
        _linear_newgelu_kernel,
        out_shape=jax.ShapeDtypeStruct((Mp, Np), x.dtype),
        grid_spec=pltpu.PrefetchScalarGridSpec(
            num_scalar_prefetch=0,
            grid=grid,
            in_specs=[
                pl.BlockSpec((tm, tk), lambda i, j, k: (i, k)),  # x tile
                pl.BlockSpec((tn, tk), lambda i, j, k: (j, k)),  # weight tile (N, K)
                pl.BlockSpec((1, tn), lambda i, j, k: (0, j)),   # bias tile
            ],
            out_specs=pl.BlockSpec((tm, tn), lambda i, j, k: (i, j)),
            scratch_shapes=[pltpu.VMEM((tm, tn), jnp.float32)],
        ),
        compiler_params=pltpu.CompilerParams(
            dimension_semantics=("parallel", "parallel", "arbitrary"),
        ),
        cost_estimate=cost,
    )(x2d, w, b2d)

    return out[:M, :N].reshape(*lead, N)


if __name__ == "__main__":
    # Small shapes implied by the forward: (batch, seq, hidden) -> (batch, seq, out)
    batch, seq, hidden, out_features = 2, 8, 32, 64

    key = jax.random.PRNGKey(0)
    kx, kw, kb = jax.random.split(key, 3)

    x = jax.random.normal(kx, (batch, seq, hidden), dtype=jnp.float32)
    # PyTorch Linear layout: weight (out_features, in_features), bias (out_features,)
    weight = jax.random.normal(kw, (out_features, hidden), dtype=jnp.float32) * 0.05
    bias = jax.random.normal(kb, (out_features,), dtype=jnp.float32) * 0.05

    y = linear_new_gelu(x, weight, bias)
    y = jax.block_until_ready(y)

    # Reference check in plain JAX (same math as the PyTorch fallback path)
    y_lin = x @ weight.T + bias
    y_ref = 0.5 * y_lin * (1.0 + jnp.tanh(_GELU_C * (y_lin + 0.044715 * y_lin ** 3)))
    assert y.shape == (batch, seq, out_features)
    assert jnp.allclose(y, y_ref, atol=1e-5, rtol=1e-5)

    print("KERNEL_OK")
</pallas_src>

<mosaic_0001>
module attributes {stable_mosaic.version = 11 : i64} {
  func.func @_linear_newgelu_kernel(%arg0: i32, %arg1: i32, %arg2: i32, %arg3: memref<16x128xf32, #tpu.memory_space<vmem>>, %arg4: memref<128x128xf32, #tpu.memory_space<vmem>>, %arg5: memref<1x128xf32, #tpu.memory_space<vmem>>, %arg6: memref<16x128xf32, #tpu.memory_space<vmem>>, %arg7: memref<16x128xf32, #tpu.memory_space<vmem>>) attributes {dimension_semantics = [#tpu.dimension_semantics<parallel>, #tpu.dimension_semantics<parallel>, #tpu.dimension_semantics<arbitrary>], iteration_bounds = array<i64: 1, 1, 1>, scalar_prefetch = 0 : i64, scratch_operands = 1 : i64, tpu.core_type = #tpu.core_type<tc>, window_params = [{transform_indices = @transform_0, window_bounds = array<i64: 16, 128>}, {transform_indices = @transform_1, window_bounds = array<i64: 128, 128>}, {transform_indices = @transform_2, window_bounds = array<i64: 1, 128>}, {transform_indices = @transform_3, window_bounds = array<i64: 16, 128>}]} {
    %c0_i32 = arith.constant 0 : i32
    %0 = arith.cmpi eq, %arg2, %c0_i32 : i32
    %1 = arith.extui %0 : i1 to i32
    %c0_i32_0 = arith.constant 0 : i32
    %2 = arith.cmpi ne, %1, %c0_i32_0 : i32
    scf.if %2 {
      %cst_10 = arith.constant 0.000000e+00 : f32
      %12 = vector.broadcast %cst_10 : f32 to vector<16x128xf32>
      %c0_11 = arith.constant 0 : index
      %c0_12 = arith.constant 0 : index
      %13 = vector.load %arg7[%c0_11, %c0_12] : memref<16x128xf32, #tpu.memory_space<vmem>>, vector<16x128xf32>
      tpu.vector_store %arg7[%c0_11, %c0_12], %12 {strides = array<i32>} : memref<16x128xf32, #tpu.memory_space<vmem>>, vector<16x128xf32>,
    } else {
    }
    %c0 = arith.constant 0 : index
    %c0_1 = arith.constant 0 : index
    %3 = vector.load %arg7[%c0, %c0_1] : memref<16x128xf32, #tpu.memory_space<vmem>>, vector<16x128xf32>
    %c0_2 = arith.constant 0 : index
    %c0_3 = arith.constant 0 : index
    %4 = vector.load %arg3[%c0_2, %c0_3] : memref<16x128xf32, #tpu.memory_space<vmem>>, vector<16x128xf32>
    %c0_4 = arith.constant 0 : index
    %c0_5 = arith.constant 0 : index
    %5 = vector.load %arg4[%c0_4, %c0_5] : memref<128x128xf32, #tpu.memory_space<vmem>>, vector<128x128xf32>
    %cst = arith.constant dense<0.000000e+00> : vector<16x128xf32>
    %6 = tpu.matmul %4, %5, %cst {dimension_numbers = #tpu.dot_dimension_numbers<[1], [1], [0], [0], [0, 0, 1, 0], [], []>} : vector<16x128xf32>, vector<128x128xf32>, vector<16x128xf32> -> vector<16x128xf32>
    %7 = arith.addf %3, %6 : vector<16x128xf32>
    %c0_6 = arith.constant 0 : index
    %c0_7 = arith.constant 0 : index
    %8 = vector.load %arg7[%c0_6, %c0_7] : memref<16x128xf32, #tpu.memory_space<vmem>>, vector<16x128xf32>
    tpu.vector_store %arg7[%c0_6, %c0_7], %7 {strides = array<i32>} : memref<16x128xf32, #tpu.memory_space<vmem>>, vector<16x128xf32>,
    %c0_i32_8 = arith.constant 0 : i32
    %9 = arith.cmpi eq, %arg2, %c0_i32_8 : i32
    %10 = arith.extui %9 : i1 to i32
    %c0_i32_9 = arith.constant 0 : i32
    %11 = arith.cmpi ne, %10, %c0_i32_9 : i32
    scf.if %11 {
      %c0_10 = arith.constant 0 : index
      %c0_11 = arith.constant 0 : index
      %12 = vector.load %arg7[%c0_10, %c0_11] : memref<16x128xf32, #tpu.memory_space<vmem>>, vector<16x128xf32>
      %c0_12 = arith.constant 0 : index
      %c0_13 = arith.constant 0 : index
      %13 = vector.load %arg5[%c0_12, %c0_13] : memref<1x128xf32, #tpu.memory_space<vmem>>, vector<1x128xf32>
      %14 = vector.broadcast %13 : vector<1x128xf32> to vector<16x128xf32>
      %15 = arith.addf %12, %14 : vector<16x128xf32>
      %16 = arith.mulf %15, %15 : vector<16x128xf32>
      %17 = arith.mulf %16, %15 : vector<16x128xf32>
      %cst_14 = arith.constant 4.471500e-02 : f32
      %18 = vector.broadcast %cst_14 : f32 to vector<16x128xf32>
      %19 = arith.mulf %18, %17 : vector<16x128xf32>
      %20 = arith.addf %15, %19 : vector<16x128xf32>
      %cst_15 = arith.constant 0.797884583 : f32
      %21 = vector.broadcast %cst_15 : f32 to vector<16x128xf32>
      %22 = arith.mulf %21, %20 : vector<16x128xf32>
      %cst_16 = arith.constant 5.000000e-01 : f32
      %23 = vector.broadcast %cst_16 : f32 to vector<16x128xf32>
      %24 = arith.mulf %23, %15 : vector<16x128xf32>
      %25 = math.tanh %22 : vector<16x128xf32>
      %cst_17 = arith.constant 1.000000e+00 : f32
      %26 = vector.broadcast %cst_17 : f32 to vector<16x128xf32>
      %27 = arith.addf %26, %25 : vector<16x128xf32>
      %28 = arith.mulf %24, %27 : vector<16x128xf32>
      %c0_18 = arith.constant 0 : index
      %c0_19 = arith.constant 0 : index
      %29 = vector.load %arg6[%c0_18, %c0_19] : memref<16x128xf32, #tpu.memory_space<vmem>>, vector<16x128xf32>
      tpu.vector_store %arg6[%c0_18, %c0_19], %28 {strides = array<i32>} : memref<16x128xf32, #tpu.memory_space<vmem>>, vector<16x128xf32>,
    } else {
    }
    return
  }
  func.func @transform_0(%arg0: i32, %arg1: i32, %arg2: i32) -> (i32, i32) {
    %c0_i32 = arith.constant 0 : i32
    return %arg0, %arg2 : i32, i32
  }
  func.func @transform_1(%arg0: i32, %arg1: i32, %arg2: i32) -> (i32, i32) {
    %c0_i32 = arith.constant 0 : i32
    return %arg1, %arg2 : i32, i32
  }
  func.func @transform_2(%arg0: i32, %arg1: i32, %arg2: i32) -> (i32, i32) {
    %c0_i32 = arith.constant 0 : i32
    %c0_i32_0 = arith.constant 0 : i32
    return %c0_i32, %arg1 : i32, i32
  }
  func.func @transform_3(%arg0: i32, %arg1: i32, %arg2: i32) -> (i32, i32) {
    %c0_i32 = arith.constant 0 : i32
    return %arg0, %arg1 : i32, i32
  }
}

</mosaic_0001>

<bundles_post_ra>
// kernel: tpu_custom_call.1
= control target key start
LH: loop header
LB: loop body
LE: loop exit
PB: predicated region body
PF: predicated region fallthrough
CT: control target
= control target key end

     0   :  { %8 = vsyncpa [#allocation4], 0  ;;  %s375_s0 = inlined_call_operand.hbm [shape: f32[16,128], index: 0, kind: input, shape index: {}]   ;;  %s376_s1 = inlined_call_operand.hbm [shape: f32[128,128], index: 1, kind: input, shape index: {}]   ;;  %s377_s2 = inlined_call_operand.vmem [shape: f32[1,128], index: 2, kind: input, shape index: {}]   ;;  %s378_s3 = inlined_call_operand.hbm [shape: f32[16,128], index: 3, kind: output, shape index: {}]  }
   0x1   :  { %9 = vsyncpa [#allocation7], 0 }
   0x2   :  { %10 = vsyncpa [#allocation5], 0  ;;  %s329_s12 = smov [#allocation3]  }
   0x3   :  { %s16_s13 = sshll.u32 %s329_s12, 4  ;;  %s17_s13 = int_to_ptr.vmem [resolvable:$true] %s16_s13 }
   0x4   :  { %s271_s14 = scalar_lea.vmem %s17_s13, 256  ;;  %p276_p1 = scmp.lt.s32.totalorder %s17_s13, %s17_s13 }
   0x5   :  { %p272_p0 = scmp.ne.s32.totalorder %s17_s13, %s271_s14  ;;  %p277_p2 = scmp.lt.s32.totalorder %s271_s14, %s271_s14 }
   0x7   :  { %p278_p3 = por %p277_p2, %p276_p1 }
   0x9   :  { %p279_p4 = pnand %p278_p3, %p272_p0 }
   0xb   :  { %282 = shalt.err (!%p279_p4)
}
   0xc   :  { %s330_s15 = smov 128   ;;  %s331_s16 = smov 8  }
   0xd   :  { %22 = dma.hbm_to_vmem [thread:$0]  %s375_s0, 256, %s17_s13, [#allocation4], %s330_s15, %s330_s15, %s331_s16  }
   0xe   :  { %s332_s19 = smov [#allocation6]  }
   0xf   :  { %s28_s20 = sshll.u32 %s332_s19, 4  ;;  %s29_s20 = int_to_ptr.vmem [resolvable:$true] %s28_s20 }
  0x10   :  { %s291_s21 = scalar_lea.vmem %s29_s20, 2048  ;;  %p296_p6 = scmp.lt.s32.totalorder %s29_s20, %s29_s20 }
  0x11   :  { %p292_p5 = scmp.ne.s32.totalorder %s29_s20, %s291_s21  ;;  %p297_p7 = scmp.lt.s32.totalorder %s291_s21, %s291_s21 }
  0x13   :  { %p298_p8 = por %p297_p7, %p296_p6 }
  0x15   :  { %p299_p9 = pnand %p298_p8, %p292_p5 }
  0x17   :  { %302 = shalt.err (!%p299_p9)
}
  0x18   :  { %34 = dma.hbm_to_vmem [thread:$0]  %s376_s1, 2048, %s29_s20, [#allocation7], %s330_s15, %s330_s15, %s331_s16  }
  0x19   :  { %323 = dma.done.wait [#allocation4], 256  }
  0x1a   :  { %324 = vsyncadd [#allocation4], 4294967040 }
  0x1b   :  { %325 = dma.done.wait [#allocation7], 2048  }
  0x1c   :  { %326 = vsyncadd [#allocation7], 4294965248  ;;  %v68_v0 = vld [vmem:[#allocation6 + $0x78] sm:$0xff]  ;;  %v67_v1 = vld [vmem:[#allocation6 + $0x70] sm:$0xff] }
  0x1d   :  { %219 = vmatprep.subr.mxu0 %v68_v0  ;;  %v66_v2 = vld [vmem:[#allocation6 + $0x68] sm:$0xff]  ;;  %v51_v3 = vld [vmem:[#allocation3] sm:$0xff]  ;;  %v65_v4 = vld [vmem:[#allocation6 + $0x60] sm:$0xff] }
  0x1e   :  { %220 = vmatpush3.xpose.msra.mxu0 %v68_v0  ;;  %251 = vmatprep.mubr.f32.mxu0 %v51_v3  ;;  %v64_v5 = vld [vmem:[#allocation6 + $0x58] sm:$0xff]  ;;  %v63_v6 = vld [vmem:[#allocation6 + $0x50] sm:$0xff]  ;;  %v62_v7 = vld [vmem:[#allocation6 + $0x48] sm:$0xff] }
  0x1f   :  { %221 = vmatprep.subr.mxu0 %v67_v1  ;;  %v61_v8 = vld [vmem:[#allocation6 + $0x40] sm:$0xff]  ;;  %v60_v9 = vld [vmem:[#allocation6 + $0x38] sm:$0xff]  ;;  %v59_v10 = vld [vmem:[#allocation6 + $0x30] sm:$0xff] }
  0x20   :  { %v58_v11 = vld [vmem:[#allocation6 + $0x28] sm:$0xff]  ;;  %v57_v12 = vld [vmem:[#allocation6 + $0x20] sm:$0xff]  ;;  %v56_v13 = vld [vmem:[#allocation6 + $0x18] sm:$0xff] }
  0x21   :  { %v55_v14 = vld [vmem:[#allocation6 + $0x10] sm:$0xff]  ;;  %v54_v15 = vld [vmem:[#allocation6 + $0x8] sm:$0xff]  ;;  %v53_v16 = vld [vmem:[#allocation6] sm:$0xff] }
  0x22   :  { %222 = vmatpush3.xpose.msra.mxu0 %v67_v1  ;;  %v52_v17 = vld [vmem:[#allocation3 + $0x8] sm:$0xff]  ;;  %v200_v18 = vld [vmem:[%s377_s2] ss:$0 sm:$0xff]  ;;  %s333_s2 = smov [#allocation8]  }
  0x23   :  { %223 = vmatprep.subr.mxu0 %v66_v2  ;;  %s187_s24 = sshll.u32 %s333_s2, 4  ;;  %s188_s24 = int_to_ptr.vmem [resolvable:$true] %s187_s24 }
  0x24   :  { %s303_s25 = scalar_lea.vmem %s188_s24, 256  ;;  %p308_p11 = scmp.lt.s32.totalorder %s188_s24, %s188_s24 }
  0x25   :  { %p304_p10 = scmp.ne.s32.totalorder %s188_s24, %s303_s25  ;;  %p309_p12 = scmp.lt.s32.totalorder %s303_s25, %s303_s25 }
  0x26   :  { %224 = vmatpush3.xpose.msra.mxu0 %v66_v2 }
  0x27   :  { %225 = vmatprep.subr.mxu0 %v65_v4  ;;  %p310_p13 = por %p309_p12, %p308_p11 }
  0x29   :  { %p311_p0 = pnand %p310_p13, %p304_p10 }
  0x2a   :  { %226 = vmatpush3.xpose.msra.mxu0 %v65_v4 }
  0x2b   :  { %227 = vmatprep.subr.mxu0 %v64_v5 }
  0x2e   :  { %228 = vmatpush3.xpose.msra.mxu0 %v64_v5 }
  0x2f   :  { %229 = vmatprep.subr.mxu0 %v63_v6 }
  0x32   :  { %230 = vmatpush3.xpose.msra.mxu0 %v63_v6 }
  0x33   :  { %231 = vmatprep.subr.mxu0 %v62_v7 }
  0x36   :  { %232 = vmatpush3.xpose.msra.mxu0 %v62_v7 }
  0x37   :  { %233 = vmatprep.subr.mxu0 %v61_v8 }
  0x3a   :  { %234 = vmatpush3.xpose.msra.mxu0 %v61_v8 }
  0x3b   :  { %235 = vmatprep.subr.mxu0 %v60_v9 }
  0x3e   :  { %236 = vmatpush3.xpose.msra.mxu0 %v60_v9 }
  0x3f   :  { %237 = vmatprep.subr.mxu0 %v59_v10 }
  0x42   :  { %238 = vmatpush3.xpose.msra.mxu0 %v59_v10 }
  0x43   :  { %239 = vmatprep.subr.mxu0 %v58_v11 }
  0x46   :  { %240 = vmatpush3.xpose.msra.mxu0 %v58_v11 }
  0x47   :  { %241 = vmatprep.subr.mxu0 %v57_v12 }
  0x4a   :  { %242 = vmatpush3.xpose.msra.mxu0 %v57_v12 }
  0x4b   :  { %243 = vmatprep.subr.mxu0 %v56_v13 }
  0x4e   :  { %244 = vmatpush3.xpose.msra.mxu0 %v56_v13 }
  0x4f   :  { %245 = vmatprep.subr.mxu0 %v55_v14 }
  0x52   :  { %246 = vmatpush3.xpose.msra.mxu0 %v55_v14 }
  0x53   :  { %247 = vmatprep.subr.mxu0 %v54_v15 }
  0x56   :  { %248 = vmatpush3.xpose.msra.mxu0 %v54_v15 }
  0x57   :  { %249 = vmatprep.subr.mxu0 %v53_v16 }
  0x5a   :  { %250 = vmatpush3.xpose.msra.mxu0 %v53_v16 }
  0x5d   :  { %252 = vmatmul.mubr.f32.vlgmr.msra.gmra.mxu0 %v52_v17 }
 0x11d   :  { %v253_v19 = vpop.f32.mrf.mxu0 }
 0x11e   :  { %v161_v20 = vadd.f32 %v253_v19, %v200_v18 }
 0x11f   :  { %v135_v21 = vpop.f32.mrf.mxu0 }
 0x120   :  { %v163_v22 = vmul.f32 %v161_v20, %v161_v20  ;;  %v160_v23 = vadd.f32 %v200_v18, %v135_v21  ;;  %v173_v34 = vmul.f32 0.5, %v161_v20 }
 0x122   :  { %v165_v24 = vmul.f32 %v163_v22, %v161_v20  ;;  %v162_v25 = vmul.f32 %v160_v23, %v160_v23  ;;  %v172_v37 = vmul.f32 0.5, %v160_v23 }
 0x124   :  { %v167_v26 = vmul.f32 0.044715, %v165_v24  ;;  %v164_v27 = vmul.f32 %v162_v25, %v160_v23 }
 0x126   :  { %v169_v28 = vadd.f32 %v167_v26, %v161_v20  ;;  %v166_v29 = vmul.f32 0.044715, %v164_v27 }
 0x128   :  { %v171_v30 = vmul.f32 0.7978846, %v169_v28  ;;  %v168_v31 = vadd.f32 %v166_v29, %v160_v23 }
 0x12a   :  { %259 = vtanh.f32 %v171_v30  ;;  %v170_v32 = vmul.f32 0.7978846, %v168_v31 }
 0x12c   :  { %261 = vtanh.f32 %v170_v32 }
 0x137   :  { %v260_v33 = vpop.eup %259 }
 0x138   :  { %v177_v35 = vadd.f32 1.0, %v260_v33 }
 0x139   :  { %v262_v36 = vpop.eup %261 }
 0x13a   :  { %v176_v38 = vadd.f32 1.0, %v262_v36  ;;  %v179_v39 = vmul.f32 %v177_v35, %v173_v34 }
 0x13c   :  { %v178_v40 = vmul.f32 %v176_v38, %v172_v37  ;;  %181 = vst [vmem:[#allocation8 + $0x8] sm:$0xff] %v179_v39 }
 0x13e   :  { %180 = vst [vmem:[#allocation8] sm:$0xff] %v178_v40 }
 0x13f   :  { %314 = shalt.err (!%p311_p0)
}
 0x140   :  { %193 = dma.vmem_to_hbm [thread:$0]  %s188_s24, 256, %s378_s3, [#allocation5], %s330_s15, %s330_s15, %s331_s16  }
 0x141   :  { %327 = dma.done.wait [#allocation5], 256  }
 0x142   :  { %328 = vsyncadd [#allocation5], 4294967040 }
 0x143   :  { %197 = vsyncpa [#allocation4], 1 }
 0x144   :  { %198 = vsyncpa [#allocation7], 1 }
 0x145   :  { %199 = vsyncpa [#allocation5], 1 }

</bundles_post_ra>
